<compile_context>
chip_gen: v7x
topology: tpu7x:2x2x1
jax: 0.10.0
libtpu: 0.0.40
codegen_flags: <defaults>
</compile_context>

<pallas_src>
import functools

import jax
import jax.numpy as jnp
from jax.experimental import pallas as pl
from jax.experimental.pallas import tpu as pltpu


def _conditioner_kernel(z_ref, c_ref, w1z_ref, w1c_ref, b1_ref, w2_ref, b2_ref,
                        o_ref, *, dim):
    # z_ref:   (tb, E)      z tile (also supplies the residual z[:, :dim])
    # c_ref:   (tb, C)      context tile
    # w1z_ref: (E, dim)     linear_1 weight (z columns), pre-transposed
    # w1c_ref: (C, dim)     linear_1 weight (context columns), pre-transposed
    # b1_ref:  (1, dim)
    # w2_ref:  (dim, dim)   linear_2 weight, pre-transposed
    # b2_ref:  (1, dim)
    # o_ref:   (tb, dim)
    z = z_ref[...]
    # linear_1 over the (virtual) concatenation [z | context]: two MXU pushes
    # accumulating in f32 instead of materializing the concat.
    h = jnp.dot(z, w1z_ref[...], preferred_element_type=jnp.float32)
    h = h + jnp.dot(c_ref[...], w1c_ref[...], preferred_element_type=jnp.float32)
    h = jnp.maximum(h + b1_ref[...], 0.0)                       # ReLU (VPU)
    # linear_2
    r = jnp.dot(h.astype(w2_ref.dtype), w2_ref[...],
                preferred_element_type=jnp.float32)
    r = r + b2_ref[...]
    # residual add from the z tile already resident in VMEM
    o_ref[...] = (z[:, :dim].astype(jnp.float32) + r).astype(o_ref.dtype)


def prepare_conditioner_params(w1, b1, w2, b2, embedding_dim):
    """One-time parameter prep from PyTorch nn.Linear layout.

    w1: (dim, E+C), b1: (dim,), w2: (dim, dim), b2: (dim,)
    Returns (w1z_t (E,dim), w1c_t (C,dim), b1 (1,dim), w2_t (dim,dim), b2 (1,dim)).
    """
    dim = w1.shape[0]
    w1z_t = jnp.asarray(w1[:, :embedding_dim]).T      # (E, dim)
    w1c_t = jnp.asarray(w1[:, embedding_dim:]).T      # (C, dim)
    w2_t = jnp.asarray(w2).T                          # (dim, dim)
    return w1z_t, w1c_t, jnp.asarray(b1).reshape(1, dim), w2_t, \
        jnp.asarray(b2).reshape(1, dim)


def conditioner_forward(z, context, w1z_t, w1c_t, b1_2d, w2_t, b2_2d, dim, *,
                        tb=512):
    """z: (B, E), context: (B, C); weights already split / transposed via
    prepare_conditioner_params."""
    B, E = z.shape
    C = context.shape[1]
    assert dim <= E, "residual z[:, :dim] requires dim <= embedding_dim"
    assert w1z_t.shape == (E, dim) and w1c_t.shape == (C, dim)
    assert w2_t.shape == (dim, dim)

    # ---- batch tile: large multiple of 8 so the grid pipelines DMA/compute ----
    tb = min(tb, B)
    if tb < B:
        tb = max(8, (tb // 8) * 8)            # (8,128) sublane rule when tiled
    Bp = ((B + tb - 1) // tb) * tb            # pad ragged batches (rows indep.)
    if Bp != B:
        pad = Bp - B
        z_in = jnp.pad(z, ((0, pad), (0, 0)))
        c_in = jnp.pad(context, ((0, pad), (0, 0)))
    else:
        z_in, c_in = z, context

    grid = (Bp // tb,)
    itemsize = jnp.dtype(z.dtype).itemsize
    w_itemsize = jnp.dtype(w1z_t.dtype).itemsize

    # ---- VMEM budget: double-buffered activation tiles + resident weights ----
    act_bytes = 2 * tb * (E + C) * itemsize + 2 * tb * dim * itemsize
    w_bytes = ((E + C) * dim + dim * dim + 2 * dim) * w_itemsize
    vmem_limit = int(min(64 << 20,
                         max(16 << 20, 2 * (act_bytes + 2 * w_bytes) + (4 << 20))))

    # ---- advisory cost estimate for XLA's scheduler ----
    flops = 2 * Bp * (E + C) * dim + 2 * Bp * dim * dim
    bytes_accessed = (Bp * (E + C) * itemsize          # read z + context
                      + Bp * dim * itemsize            # write out
                      + w_bytes)                       # read weights once
    cost = pl.CostEstimate(flops=int(flops), transcendentals=0,
                           bytes_accessed=int(bytes_accessed))

    kernel = functools.partial(_conditioner_kernel, dim=dim)

    out = pl.pallas_call(
        kernel,
        out_shape=jax.ShapeDtypeStruct((Bp, dim), z.dtype),
        grid_spec=pltpu.PrefetchScalarGridSpec(
            num_scalar_prefetch=0,
            grid=grid,
            in_specs=[
                pl.BlockSpec((tb, E), lambda i: (i, 0)),      # z tile
                pl.BlockSpec((tb, C), lambda i: (i, 0)),      # context tile
                pl.BlockSpec((E, dim), lambda i: (0, 0)),     # W1_z^T (resident)
                pl.BlockSpec((C, dim), lambda i: (0, 0)),     # W1_c^T (resident)
                pl.BlockSpec((1, dim), lambda i: (0, 0)),     # b1
                pl.BlockSpec((dim, dim), lambda i: (0, 0)),   # W2^T (resident)
                pl.BlockSpec((1, dim), lambda i: (0, 0)),     # b2
            ],
            out_specs=pl.BlockSpec((tb, dim), lambda i: (i, 0)),
        ),
        compiler_params=pltpu.CompilerParams(
            dimension_semantics=("parallel",),
            vmem_limit_bytes=vmem_limit),
        cost_estimate=cost,
    )(z_in, c_in, w1z_t, w1c_t, b1_2d, w2_t, b2_2d)

    if Bp != B:
        out = out[:B]
    return out


def reference_forward(z, context, w1, b1, w2, b2, dim):
    x = jnp.concatenate([z, context], axis=1)
    h = jnp.maximum(x @ w1.T + b1, 0.0)
    r = h @ w2.T + b2
    return z[:, :dim] + r


def _make_params(key, dim, embedding_dim, context_embedding_dim):
    kw1, kb1, kw2, kb2 = jax.random.split(key, 4)
    in1 = embedding_dim + context_embedding_dim
    bnd1 = 1.0 / jnp.sqrt(in1)
    bnd2 = 1.0 / jnp.sqrt(dim)
    w1 = jax.random.uniform(kw1, (dim, in1), jnp.float32, -bnd1, bnd1)
    b1 = jax.random.uniform(kb1, (dim,), jnp.float32, -bnd1, bnd1)
    w2 = jax.random.uniform(kw2, (dim, dim), jnp.float32, -bnd2, bnd2)
    b2 = jax.random.uniform(kb2, (dim,), jnp.float32, -bnd2, bnd2)
    return w1, b1, w2, b2


if __name__ == "__main__":
    embedding_dim = 32          # z features (E)
    context_embedding_dim = 16  # context features (C)
    dim = 16                    # Conditioner output dim (<= embedding_dim)

    key = jax.random.PRNGKey(0)
    kdata, kparam, kdata2 = jax.random.split(key, 3)

    w1, b1, w2, b2 = _make_params(kparam, dim, embedding_dim,
                                  context_embedding_dim)
    # One-time parameter preparation (hoisted out of the forward path).
    w1z_t, w1c_t, b1_2d, w2_t, b2_2d = prepare_conditioner_params(
        w1, b1, w2, b2, embedding_dim)

    # ---- Test 1: small batch, single grid step ----
    B = 8
    kz, kc = jax.random.split(kdata)
    z = jax.random.normal(kz, (B, embedding_dim), dtype=jnp.float32)
    context = jax.random.normal(kc, (B, context_embedding_dim),
                                dtype=jnp.float32)
    out = conditioner_forward(z, context, w1z_t, w1c_t, b1_2d, w2_t, b2_2d, dim)
    out = jax.block_until_ready(out)
    ref = reference_forward(z, context, w1, b1, w2, b2, dim)
    assert out.shape == (B, dim)
    assert jnp.allclose(out, ref, atol=1e-5, rtol=1e-5), "mismatch (small batch)"

    # ---- Test 2: ragged batch exercising multi-step grid + padding path ----
    B2 = 300
    kz2, kc2 = jax.random.split(kdata2)
    z2 = jax.random.normal(kz2, (B2, embedding_dim), dtype=jnp.float32)
    context2 = jax.random.normal(kc2, (B2, context_embedding_dim),
                                 dtype=jnp.float32)
    out2 = conditioner_forward(z2, context2, w1z_t, w1c_t, b1_2d, w2_t, b2_2d,
                               dim, tb=128)
    out2 = jax.block_until_ready(out2)
    ref2 = reference_forward(z2, context2, w1, b1, w2, b2, dim)
    assert out2.shape == (B2, dim)
    assert jnp.allclose(out2, ref2, atol=1e-5, rtol=1e-5), "mismatch (tiled batch)"

    print("KERNEL_OK")
</pallas_src>

<mosaic_0001>
module attributes {stable_mosaic.version = 11 : i64} {
  func.func @_conditioner_kernel(%arg0: i32, %arg1: memref<8x32xf32, #tpu.memory_space<vmem>>, %arg2: memref<8x16xf32, #tpu.memory_space<vmem>>, %arg3: memref<32x16xf32, #tpu.memory_space<vmem>>, %arg4: memref<16x16xf32, #tpu.memory_space<vmem>>, %arg5: memref<1x16xf32, #tpu.memory_space<vmem>>, %arg6: memref<16x16xf32, #tpu.memory_space<vmem>>, %arg7: memref<1x16xf32, #tpu.memory_space<vmem>>, %arg8: memref<8x16xf32, #tpu.memory_space<vmem>>) attributes {dimension_semantics = [#tpu.dimension_semantics<parallel>], iteration_bounds = array<i64: 1>, scalar_prefetch = 0 : i64, scratch_operands = 0 : i64, tpu.core_type = #tpu.core_type<tc>, window_params = [{transform_indices = @transform_0, window_bounds = array<i64: 8, 32>}, {transform_indices = @transform_1, window_bounds = array<i64: 8, 16>}, {pipeline_mode = #tpu.pipeline_mode<synchronous>, transform_indices = @transform_2, window_bounds = array<i64: 32, 16>}, {pipeline_mode = #tpu.pipeline_mode<synchronous>, transform_indices = @transform_3, window_bounds = array<i64: 16, 16>}, {pipeline_mode = #tpu.pipeline_mode<synchronous>, transform_indices = @transform_4, window_bounds = array<i64: 1, 16>}, {pipeline_mode = #tpu.pipeline_mode<synchronous>, transform_indices = @transform_5, window_bounds = array<i64: 16, 16>}, {pipeline_mode = #tpu.pipeline_mode<synchronous>, transform_indices = @transform_6, window_bounds = array<i64: 1, 16>}, {transform_indices = @transform_7, window_bounds = array<i64: 8, 16>}]} {
    %c0 = arith.constant 0 : index
    %c0_0 = arith.constant 0 : index
    %0 = vector.load %arg1[%c0, %c0_0] : memref<8x32xf32, #tpu.memory_space<vmem>>, vector<8x32xf32>
    %c0_1 = arith.constant 0 : index
    %c0_2 = arith.constant 0 : index
    %1 = vector.load %arg3[%c0_1, %c0_2] : memref<32x16xf32, #tpu.memory_space<vmem>>, vector<32x16xf32>
    %cst = arith.constant dense<0.000000e+00> : vector<8x16xf32>
    %2 = tpu.matmul %0, %1, %cst {dimension_numbers = #tpu.dot_dimension_numbers<[1], [0], [0], [1], [0, 0, 1, 1], [], []>} : vector<8x32xf32>, vector<32x16xf32>, vector<8x16xf32> -> vector<8x16xf32>
    %c0_3 = arith.constant 0 : index
    %c0_4 = arith.constant 0 : index
    %3 = vector.load %arg2[%c0_3, %c0_4] : memref<8x16xf32, #tpu.memory_space<vmem>>, vector<8x16xf32>
    %c0_5 = arith.constant 0 : index
    %c0_6 = arith.constant 0 : index
    %4 = vector.load %arg4[%c0_5, %c0_6] : memref<16x16xf32, #tpu.memory_space<vmem>>, vector<16x16xf32>
    %cst_7 = arith.constant dense<0.000000e+00> : vector<8x16xf32>
    %5 = tpu.matmul %3, %4, %cst_7 {dimension_numbers = #tpu.dot_dimension_numbers<[1], [0], [0], [1], [0, 0, 1, 1], [], []>} : vector<8x16xf32>, vector<16x16xf32>, vector<8x16xf32> -> vector<8x16xf32>
    %6 = arith.addf %2, %5 : vector<8x16xf32>
    %c0_8 = arith.constant 0 : index
    %c0_9 = arith.constant 0 : index
    %7 = vector.load %arg5[%c0_8, %c0_9] : memref<1x16xf32, #tpu.memory_space<vmem>>, vector<1x16xf32>
    %8 = vector.broadcast %7 : vector<1x16xf32> to vector<8x16xf32>
    %9 = arith.addf %6, %8 : vector<8x16xf32>
    %cst_10 = arith.constant 0.000000e+00 : f32
    %10 = vector.broadcast %cst_10 : f32 to vector<8x16xf32>
    %11 = arith.maximumf %9, %10 : vector<8x16xf32>
    %c0_11 = arith.constant 0 : index
    %c0_12 = arith.constant 0 : index
    %12 = vector.load %arg6[%c0_11, %c0_12] : memref<16x16xf32, #tpu.memory_space<vmem>>, vector<16x16xf32>
    %cst_13 = arith.constant dense<0.000000e+00> : vector<8x16xf32>
    %13 = tpu.matmul %11, %12, %cst_13 {dimension_numbers = #tpu.dot_dimension_numbers<[1], [0], [0], [1], [0, 0, 1, 1], [], []>} : vector<8x16xf32>, vector<16x16xf32>, vector<8x16xf32> -> vector<8x16xf32>
    %c0_14 = arith.constant 0 : index
    %c0_15 = arith.constant 0 : index
    %14 = vector.load %arg7[%c0_14, %c0_15] : memref<1x16xf32, #tpu.memory_space<vmem>>, vector<1x16xf32>
    %15 = vector.broadcast %14 : vector<1x16xf32> to vector<8x16xf32>
    %16 = arith.addf %13, %15 : vector<8x16xf32>
    %17 = vector.extract_strided_slice %0 {offsets = [0, 0], sizes = [8, 16], strides = [1, 1]} : vector<8x32xf32> to vector<8x16xf32>
    %18 = arith.addf %17, %16 : vector<8x16xf32>
    %c0_16 = arith.constant 0 : index
    %c0_17 = arith.constant 0 : index
    %19 = vector.load %arg8[%c0_16, %c0_17] : memref<8x16xf32, #tpu.memory_space<vmem>>, vector<8x16xf32>
    tpu.vector_store %arg8[%c0_16, %c0_17], %18 {strides = array<i32>} : memref<8x16xf32, #tpu.memory_space<vmem>>, vector<8x16xf32>,
    return
  }
  func.func @transform_0(%arg0: i32) -> (i32, i32) {
    %c0_i32 = arith.constant 0 : i32
    %c0_i32_0 = arith.constant 0 : i32
    return %arg0, %c0_i32 : i32, i32
  }
  func.func @transform_1(%arg0: i32) -> (i32, i32) {
    %c0_i32 = arith.constant 0 : i32
    %c0_i32_0 = arith.constant 0 : i32
    return %arg0, %c0_i32 : i32, i32
  }
  func.func @transform_2(%arg0: i32) -> (i32, i32) {
    %c0_i32 = arith.constant 0 : i32
    %c0_i32_0 = arith.constant 0 : i32
    %c0_i32_1 = arith.constant 0 : i32
    return %c0_i32, %c0_i32_0 : i32, i32
  }
  func.func @transform_3(%arg0: i32) -> (i32, i32) {
    %c0_i32 = arith.constant 0 : i32
    %c0_i32_0 = arith.constant 0 : i32
    %c0_i32_1 = arith.constant 0 : i32
    return %c0_i32, %c0_i32_0 : i32, i32
  }
  func.func @transform_4(%arg0: i32) -> (i32, i32) {
    %c0_i32 = arith.constant 0 : i32
    %c0_i32_0 = arith.constant 0 : i32
    %c0_i32_1 = arith.constant 0 : i32
    return %c0_i32, %c0_i32_0 : i32, i32
  }
  func.func @transform_5(%arg0: i32) -> (i32, i32) {
    %c0_i32 = arith.constant 0 : i32
    %c0_i32_0 = arith.constant 0 : i32
    %c0_i32_1 = arith.constant 0 : i32
    return %c0_i32, %c0_i32_0 : i32, i32
  }
  func.func @transform_6(%arg0: i32) -> (i32, i32) {
    %c0_i32 = arith.constant 0 : i32
    %c0_i32_0 = arith.constant 0 : i32
    %c0_i32_1 = arith.constant 0 : i32
    return %c0_i32, %c0_i32_0 : i32, i32
  }
  func.func @transform_7(%arg0: i32) -> (i32, i32) {
    %c0_i32 = arith.constant 0 : i32
    %c0_i32_0 = arith.constant 0 : i32
    return %arg0, %c0_i32 : i32, i32
  }
}

</mosaic_0001>

<bundles_post_ra>
// kernel: tpu_custom_call.1
= control target key start
LH: loop header
LB: loop body
LE: loop exit
PB: predicated region body
PF: predicated region fallthrough
CT: control target
= control target key end

     0   :  { %v371_v3 = vmov 0.0|0.0   ;;  %vm372_vm0 = vmmov 0   ;;  %v373_v9 = vmov 0.0   ;;  %s469_s0 = inlined_call_operand.vmem [shape: f32[8,32], index: 0, kind: input, shape index: {}]   ;;  %s470_s1 = inlined_call_operand.vmem [shape: f32[8,16], index: 1, kind: input, shape index: {}]   ;;  %s471_s2 = inlined_call_operand.vmem [shape: f32[32,16], index: 2, kind: input, shape index: {}]   ;;  %s472_s3 = inlined_call_operand.vmem [shape: f32[16,16], index: 3, kind: input, shape index: {}]   ;;  %s473_s4 = inlined_call_operand.vmem [shape: f32[1,16], index: 4, kind: input, shape index: {}]   ;;  %s474_s5 = inlined_call_operand.vmem [shape: f32[16,16], index: 5, kind: input, shape index: {}]   ;;  %s475_s6 = inlined_call_operand.vmem [shape: f32[1,16], index: 6, kind: input, shape index: {}]   ;;  %s476_s7 = inlined_call_operand.hbm [shape: f32[8,16], index: 7, kind: output, shape index: {}]  }
   0x1   :  { %v28_v0 = vld [vmem:[%s471_s2] sm:$0xff]  ;;  %v29_v1 = vld [vmem:[%s471_s2 + $0x8] sm:$0xff]  ;;  %334 = vmatprep.subr.bf16.mxu1 %v371_v3  ;;  %331 = vmatprep.subr.bf16.mxu0 %v371_v3  ;;  %v30_v6 = vld [vmem:[%s471_s2 + $0x10] sm:$0xff] }
   0x2   :  { %v33_v2 = vld [vmem:[%s472_s3] sm:$0xff]  ;;  %v335_v4 = vpack.c.bf16 %v29_v1, %v28_v0  ;;  %v34_v5 = vld [vmem:[%s472_s3 + $0x8] sm:$0xff]  ;;  %v31_v7 = vld [vmem:[%s471_s2 + $0x18] sm:$0xff]  ;;  %310 = vmatprep.mubr.msk.f32.mxu0 %vm372_vm0, %v373_v9  ;;  %321 = vmatprep.mubr.msk.f32.mxu1 %vm372_vm0, %v373_v9 }
   0x3   :  { %v332_v8 = vpack.c.bf16 %v34_v5, %v33_v2 }
   0x4   :  { %12 = vsyncpa [#allocation3], 0  ;;  %336 = vmatpush3.bf16.msra.mxu1 %v335_v4  ;;  %v338_v10 = vpack.c.bf16 %v31_v7, %v30_v6  ;;  %v32_v11 = vld [vmem:[%s470_s1] sm:$0xff]  ;;  %vm35_vm1 = vcmask 130048   ;;  %vm109_vm2 = vcmask 261120   ;;  %v193_v14 = vld [vmem:[%s474_s5 + $0x8] sm:$0xff] }
   0x5   :  { %333 = vmatpush3.bf16.msra.mxu0 %v332_v8  ;;  %337 = vmatprep.subr.bf16.mxu1 %v371_v3  ;;  %v27_v12 = vld [vmem:[%s469_s0] sm:$0xff] }
   0x6   :  { %340 = vmatprep.subr.bf16.mxu0 %v371_v3  ;;  %v192_v13 = vld [vmem:[%s474_s5] sm:$0xff]  ;;  %s374_s5 = smov [#allocation2]  }
   0x7   :  { %v341_v15 = vpack.c.bf16 %v193_v14, %v192_v13  ;;  %v292_v19 = vld [vmem:[%s473_s4] ss:$0 sm:$0xff]  ;;  %s282_s21 = sshll.u32 %s374_s5, 4  ;;  %s283_s21 = int_to_ptr.vmem [resolvable:$true] %s282_s21 }
   0x8   :  { %339 = vmatpush3.bf16.msra.mxu1 %v338_v10  ;;  %311 = vmatmul.mubr.msk.f32.vlgmr.msra.gmra.mrb[0].mxu0 %vm35_vm1, %v32_v11  ;;  %v293_v24 = vld [vmem:[%s475_s6] ss:$0 sm:$0xff]  ;;  %s347_s4 = scalar_lea.vmem %s283_s21, 128  ;;  %p352_p1 = scmp.lt.s32.totalorder %s283_s21, %s283_s21 }
   0x9   :  { %328 = vmatprep.mubr.msk.f32.mxu0 %vm372_vm0, %v373_v9  ;;  %342 = vmatpush3.bf16.msra.mxu0 %v341_v15  ;;  %p348_p0 = scmp.ne.s32.totalorder %s283_s21, %s347_s4  ;;  %p353_p2 = scmp.lt.s32.totalorder %s347_s4, %s347_s4 }
   0xb   :  { %322 = vmatmul.mubr.msk.f32.vlgmr.msra.gmra.mrb[0].mxu1 %vm109_vm2, %v27_v12  ;;  %p354_p3 = por %p353_p2, %p352_p1 }
   0xd   :  { %p355_p4 = pnand %p354_p3, %p348_p0 }
  0xdb   :  { %v105_v16 = vpop.f32.mrb[0].mxu0 }
  0xdc   :  { %v312_v17 = vpop.f32.mrb[1].mxu0 }
  0xde   :  { %v179_v18 = vpop.f32.mrb[0].mxu1 }
  0xdf   :  { %v180_v20 = vadd.f32 %v179_v18, %v105_v16  ;;  %v323_v21 = vpop.f32.mrb[1].mxu1 }
  0xe1   :  { %v190_v22 = vadd.f32 %v292_v19, %v180_v20 }
  0xe3   :  { %v191_v23 = vmax.f32 %v190_v22, 0.0 }
  0xe5   :  { %329 = vmatmul.mubr.msk.f32.vlgmr.msra.gmra.mrb[2].mxu0 %vm35_vm1, %v191_v23 }
 0x1b8   :  { %v270_v25 = vpop.f32.mrb[2].mxu0 }
 0x1b9   :  { %v271_v26 = vadd.f32 %v293_v24, %v270_v25  ;;  %v330_v27 = vpop.f32.mrb[3].mxu0 }
 0x1bb   :  { %v274_v28 = vadd.f32 %v271_v26, %v27_v12 }
 0x1bd   :  { %275 = vst.msk [vmem:[#allocation2] sm:$0xff] %vm35_vm1, %v274_v28 }
 0x1be   :  { %358 = shalt.err (!%p355_p4)
}
 0x1bf   :  { %s359_s6 = scalar_lea.hbm %s476_s7, 128 }
 0x1c0   :  { %p360_p5 = scmp.ne.s32.totalorder %s476_s7, %s359_s6  ;;  %p363_p6 = scmp.lt.u32.totalorder %s359_s6, %s476_s7 }
 0x1c2   :  { %p365_p7 = pnand %p363_p6, %p360_p5 }
 0x1c4   :  { %368 = shalt.err (!%p365_p7)
}
 0x1c5   :  { %285 = dma.vmem_to_hbm [thread:$0]  %s283_s21, 128, %s476_s7, [#allocation3]  }
 0x1c6   :  { %369 = dma.done.wait [#allocation3], 128  }
 0x1c7   :  { %370 = vsyncadd [#allocation3], 4294967168 }
 0x1c8   :  { %289 = vsyncpa [#allocation3], 1 }

</bundles_post_ra>
